<compile_context>
chip_gen: v7x
topology: tpu7x:2x2x1
jax: 0.10.0
libtpu: 0.0.40
codegen_flags: <defaults>
</compile_context>

<pallas_src>
import math
import functools

import jax
import jax.numpy as jnp
from jax.experimental import pallas as pl
from jax.experimental.pallas import tpu as pltpu

_VMEM_LIMIT = 32 * 1024 * 1024  # above v5e's 16 MiB scoped default, safe on all gens


def qkv_proj_kernel(x_ref, w_ref, b_ref, q_ref, k_ref, v_ref, *,
                    num_heads, head_dim, embed_dim):
    """Fused QKV projection for one (batch, seq-tile) block.

    x_ref:   [1, Ts, E]    bf16
    w_ref:   [E, 3E]       bf16   (Wq*scale | Wk | Wv)
    b_ref:   [1, 3E]       f32    (bq*scale | bk | bv)
    q_ref:   [1, H, Ts, D] bf16
    k_ref:   [1, H, D, Ts] bf16   (pre-transposed for the scores matmul)
    v_ref:   [1, H, Ts, D] bf16
    """
    x = x_ref[0]                                                       # [Ts, E]
    qkv = jnp.dot(x, w_ref[...],
                  preferred_element_type=jnp.float32) + b_ref[...]     # [Ts, 3E] f32
    ts = x.shape[0]

    def head_split(col):
        part = qkv[:, col * embed_dim:(col + 1) * embed_dim]           # [Ts, E]
        return part.reshape(ts, num_heads, head_dim)                   # [Ts, H, D]

    q = head_split(0)
    k = head_split(1)
    v = head_split(2)
    q_ref[0] = jnp.transpose(q, (1, 0, 2)).astype(q_ref.dtype)         # [H, Ts, D]
    k_ref[0] = jnp.transpose(k, (1, 2, 0)).astype(k_ref.dtype)         # [H, D, Ts]
    v_ref[0] = jnp.transpose(v, (1, 0, 2)).astype(v_ref.dtype)         # [H, Ts, D]


def flash_attn_kernel(q_ref, k_ref, v_ref, wo_ref, bo_ref, o_ref,
                      m_sc, l_sc, acc_sc, *, num_heads, head_dim):
    """Online-softmax attention over one (batch, q-tile, kv-tile) step.

    q_ref: [1, H, Tq,  D] bf16 (already scaled by 1/sqrt(D) via the weights)
    k_ref: [1, H, D, Tkv] bf16 (pre-transposed)
    v_ref: [1, H, Tkv, D] bf16
    wo_ref: [E, E] bf16,  bo_ref: [1, E] f32
    o_ref: [1, Tq, E]
    scratch: m_sc/l_sc [H, Tq, 1] f32, acc_sc [H, Tq, D] f32
    """
    ki = pl.program_id(2)

    @pl.when(ki == 0)
    def _init():
        m_sc[...] = jnp.full(m_sc.shape, -jnp.inf, jnp.float32)
        l_sc[...] = jnp.zeros(l_sc.shape, jnp.float32)
        acc_sc[...] = jnp.zeros(acc_sc.shape, jnp.float32)

    q = q_ref[0]                                                       # [H, Tq, D]
    k_t = k_ref[0]                                                     # [H, D, Tkv]
    v = v_ref[0]                                                       # [H, Tkv, D]

    # Heads batched into one MXU contraction; natural [M,K]x[K,N] layout,
    # f32 scores for a stable softmax.
    s = jnp.einsum('hqd,hdk->hqk', q, k_t,
                   preferred_element_type=jnp.float32)                 # [H, Tq, Tkv]

    m_prev = m_sc[...]
    m_new = jnp.maximum(m_prev, jnp.max(s, axis=-1, keepdims=True))    # [H, Tq, 1]
    alpha = jnp.exp(m_prev - m_new)                                    # EUP
    p = jnp.exp(s - m_new)                                             # [H, Tq, Tkv]
    l_sc[...] = alpha * l_sc[...] + jnp.sum(p, axis=-1, keepdims=True)
    acc_sc[...] = alpha * acc_sc[...] + jnp.einsum(
        'hqk,hkd->hqd', p.astype(v.dtype), v,
        preferred_element_type=jnp.float32)                            # [H, Tq, D]
    m_sc[...] = m_new

    # TODO(synk): nn.Dropout on attention_probs omitted (eval-mode identity).

    @pl.when(ki == pl.num_programs(2) - 1)
    def _finalize():
        inv_l = pl.reciprocal(l_sc[...], approx=True)                  # EUP slot
        ctx = acc_sc[...] * inv_l                                      # [H, Tq, D]
        tq = ctx.shape[1]
        ctx = jnp.transpose(ctx, (1, 0, 2)).reshape(tq, num_heads * head_dim)
        out = jnp.dot(ctx.astype(wo_ref.dtype), wo_ref[...],
                      preferred_element_type=jnp.float32) + bo_ref[...]
        o_ref[0] = out.astype(o_ref.dtype)                             # lane-dense store


def _pick_tile(seq_len, cap=256):
    if seq_len <= cap:
        return seq_len
    for t in (256, 128, 64, 32, 16, 8):
        if t <= cap and seq_len % t == 0:
            return t
    return seq_len  # fallback: whole sequence as one block


def multi_head_attention(hidden_states, params, *, num_heads,
                         q_tile=None, kv_tile=None):
    B, S, E = hidden_states.shape
    assert E % num_heads == 0
    D = E // num_heads
    wq, bq, wk, bk, wv, bv, wo, bo = params  # weights [E,E] (in,out), biases [1,E]

    scale = 1.0 / math.sqrt(D)
    # Fuse QKV into one [E, 3E] weight; fold the softmax scale into Wq/bq.
    w_qkv = jnp.concatenate([wq * scale, wk, wv], axis=1).astype(jnp.bfloat16)
    b_qkv = jnp.concatenate([bq * scale, bk, bv], axis=1).astype(jnp.float32)
    x_bf16 = hidden_states.astype(jnp.bfloat16)
    wo_bf16 = wo.astype(jnp.bfloat16)
    bo_f32 = bo.astype(jnp.float32)

    Tq = q_tile if q_tile is not None else _pick_tile(S)
    Tkv = kv_tile if kv_tile is not None else _pick_tile(S)
    assert S % Tq == 0 and S % Tkv == 0

    # ---- Kernel 1: fused QKV projection, heads split once --------------------
    proj_kernel = functools.partial(qkv_proj_kernel, num_heads=num_heads,
                                    head_dim=D, embed_dim=E)
    qv_out_spec = pl.BlockSpec((1, num_heads, Tq, D), lambda b, s: (b, 0, s, 0))
    k_out_spec = pl.BlockSpec((1, num_heads, D, Tq), lambda b, s: (b, 0, 0, s))
    q, k, v = pl.pallas_call(
        proj_kernel,
        out_shape=(jax.ShapeDtypeStruct((B, num_heads, S, D), jnp.bfloat16),
                   jax.ShapeDtypeStruct((B, num_heads, D, S), jnp.bfloat16),
                   jax.ShapeDtypeStruct((B, num_heads, S, D), jnp.bfloat16)),
        grid_spec=pltpu.PrefetchScalarGridSpec(
            num_scalar_prefetch=0,
            grid=(B, S // Tq),
            in_specs=[
                pl.BlockSpec((1, Tq, E), lambda b, s: (b, s, 0)),     # x
                pl.BlockSpec((E, 3 * E), lambda b, s: (0, 0)),        # fused W
                pl.BlockSpec((1, 3 * E), lambda b, s: (0, 0)),        # fused b
            ],
            out_specs=[qv_out_spec, k_out_spec, qv_out_spec],
        ),
        compiler_params=pltpu.CompilerParams(
            dimension_semantics=("parallel", "parallel"),
            vmem_limit_bytes=_VMEM_LIMIT),
    )(x_bf16, w_qkv, b_qkv)

    # ---- Kernel 2: flash attention + fused output projection ----------------
    attn_kernel = functools.partial(flash_attn_kernel, num_heads=num_heads,
                                    head_dim=D)
    out = pl.pallas_call(
        attn_kernel,
        out_shape=jax.ShapeDtypeStruct((B, S, E), hidden_states.dtype),
        grid_spec=pltpu.PrefetchScalarGridSpec(
            num_scalar_prefetch=0,
            grid=(B, S // Tq, S // Tkv),
            in_specs=[
                pl.BlockSpec((1, num_heads, Tq, D), lambda b, qi, ki: (b, 0, qi, 0)),
                pl.BlockSpec((1, num_heads, D, Tkv), lambda b, qi, ki: (b, 0, 0, ki)),
                pl.BlockSpec((1, num_heads, Tkv, D), lambda b, qi, ki: (b, 0, ki, 0)),
                pl.BlockSpec((E, E), lambda b, qi, ki: (0, 0)),        # Wo
                pl.BlockSpec((1, E), lambda b, qi, ki: (0, 0)),        # bo
            ],
            out_specs=pl.BlockSpec((1, Tq, E), lambda b, qi, ki: (b, qi, 0)),
            scratch_shapes=[
                pltpu.VMEM((num_heads, Tq, 1), jnp.float32),   # running max
                pltpu.VMEM((num_heads, Tq, 1), jnp.float32),   # running sum
                pltpu.VMEM((num_heads, Tq, D), jnp.float32),   # output accumulator
            ],
        ),
        compiler_params=pltpu.CompilerParams(
            dimension_semantics=("parallel", "parallel", "arbitrary"),
            vmem_limit_bytes=_VMEM_LIMIT),
    )(q, k, v, wo_bf16, bo_f32)
    return out


def reference_mha(x, params, *, num_heads):
    """Pure-JAX f32 reference mirroring the PyTorch forward (eval mode)."""
    wq, bq, wk, bk, wv, bv, wo, bo = params
    B, S, E = x.shape
    D = E // num_heads

    def split_heads(t):  # [B,S,E] -> [B,H,S,D]
        return t.reshape(B, S, num_heads, D).transpose(0, 2, 1, 3)

    q = split_heads(x @ wq + bq)
    k = split_heads(x @ wk + bk)
    v = split_heads(x @ wv + bv)
    scores = jnp.einsum("bhqd,bhkd->bhqk", q, k) / math.sqrt(D)
    probs = jax.nn.softmax(scores, axis=-1)
    ctx = jnp.einsum("bhqk,bhkd->bhqd", probs, v)
    ctx = ctx.transpose(0, 2, 1, 3).reshape(B, S, E)
    return ctx @ wo + bo


def _make_params(key, E):
    keys = jax.random.split(key, 8)

    def lin(kw, kb):
        w = 0.05 * jax.random.normal(kw, (E, E), dtype=jnp.float32)  # [in, out]
        b = 0.05 * jax.random.normal(kb, (1, E), dtype=jnp.float32)
        return w, b

    wq, bq = lin(keys[0], keys[1])
    wk, bk = lin(keys[2], keys[3])
    wv, bv = lin(keys[4], keys[5])
    wo, bo = lin(keys[6], keys[7])
    return (wq, bq, wk, bk, wv, bv, wo, bo)


if __name__ == "__main__":
    # EncoderConfig-like small sizes: embedding_dimension=32, num_attention_heads=4
    B, S, E, H = 2, 8, 32, 4
    key = jax.random.PRNGKey(0)
    kx, kp, kx2, kp2 = jax.random.split(key, 4)

    x = jax.random.normal(kx, (B, S, E), dtype=jnp.float32)
    params = _make_params(kp, E)

    out = multi_head_attention(x, params, num_heads=H)
    out = jax.block_until_ready(out)
    ref = reference_mha(x, params, num_heads=H)
    assert out.shape == (B, S, E)
    assert jnp.allclose(out, ref, atol=2e-2, rtol=2e-2), (
        f"mismatch vs reference, max abs err {jnp.max(jnp.abs(out - ref))}")

    # Second check: exercises the multi-tile flash path (grid = (2, 2, 2)).
    B2, S2, E2, H2 = 2, 256, 128, 4
    x2 = jax.random.normal(kx2, (B2, S2, E2), dtype=jnp.float32)
    params2 = _make_params(kp2, E2)
    out2 = multi_head_attention(x2, params2, num_heads=H2, q_tile=128, kv_tile=128)
    out2 = jax.block_until_ready(out2)
    ref2 = reference_mha(x2, params2, num_heads=H2)
    assert jnp.allclose(out2, ref2, atol=2e-2, rtol=2e-2), (
        f"tiled mismatch vs reference, max abs err {jnp.max(jnp.abs(out2 - ref2))}")

    print("KERNEL_OK")
</pallas_src>

<mosaic_0001>
module attributes {stable_mosaic.version = 11 : i64} {
  func.func @qkv_proj_kernel(%arg0: i32, %arg1: i32, %arg2: memref<1x8x32xbf16, #tpu.memory_space<vmem>>, %arg3: memref<32x96xbf16, #tpu.memory_space<vmem>>, %arg4: memref<1x96xf32, #tpu.memory_space<vmem>>, %arg5: memref<1x4x8x8xbf16, #tpu.memory_space<vmem>>, %arg6: memref<1x4x8x8xbf16, #tpu.memory_space<vmem>>, %arg7: memref<1x4x8x8xbf16, #tpu.memory_space<vmem>>) attributes {dimension_semantics = [#tpu.dimension_semantics<parallel>, #tpu.dimension_semantics<parallel>], iteration_bounds = array<i64: 2, 1>, scalar_prefetch = 0 : i64, scratch_operands = 0 : i64, tpu.core_type = #tpu.core_type<tc>, window_params = [{transform_indices = @transform_0, window_bounds = array<i64: 1, 8, 32>}, {pipeline_mode = #tpu.pipeline_mode<synchronous>, transform_indices = @transform_1, window_bounds = array<i64: 32, 96>}, {pipeline_mode = #tpu.pipeline_mode<synchronous>, transform_indices = @transform_2, window_bounds = array<i64: 1, 96>}, {transform_indices = @transform_3, window_bounds = array<i64: 1, 4, 8, 8>}, {transform_indices = @transform_4, window_bounds = array<i64: 1, 4, 8, 8>}, {transform_indices = @transform_5, window_bounds = array<i64: 1, 4, 8, 8>}]} {
    %c0 = arith.constant 0 : index
    %c0_0 = arith.constant 0 : index
    %c0_1 = arith.constant 0 : index
    %0 = vector.load %arg2[%c0, %c0_0, %c0_1] : memref<1x8x32xbf16, #tpu.memory_space<vmem>>, vector<1x8x32xbf16>
    %1 = vector.shape_cast %0 : vector<1x8x32xbf16> to vector<8x32xbf16>
    %c0_2 = arith.constant 0 : index
    %c0_3 = arith.constant 0 : index
    %2 = vector.load %arg3[%c0_2, %c0_3] : memref<32x96xbf16, #tpu.memory_space<vmem>>, vector<32x96xbf16>
    %cst = arith.constant dense<0.000000e+00> : vector<8x96xf32>
    %3 = tpu.matmul %1, %2, %cst {dimension_numbers = #tpu.dot_dimension_numbers<[1], [0], [0], [1], [0, 0, 1, 1], [], []>} : vector<8x32xbf16>, vector<32x96xbf16>, vector<8x96xf32> -> vector<8x96xf32>
    %c0_4 = arith.constant 0 : index
    %c0_5 = arith.constant 0 : index
    %4 = vector.load %arg4[%c0_4, %c0_5] : memref<1x96xf32, #tpu.memory_space<vmem>>, vector<1x96xf32>
    %5 = vector.broadcast %4 : vector<1x96xf32> to vector<8x96xf32>
    %6 = arith.addf %3, %5 : vector<8x96xf32>
    %7 = vector.extract_strided_slice %6 {offsets = [0, 0], sizes = [8, 32], strides = [1, 1]} : vector<8x96xf32> to vector<8x32xf32>
    %8 = vector.shape_cast %7 : vector<8x32xf32> to vector<8x4x8xf32>
    %9 = vector.extract_strided_slice %6 {offsets = [0, 32], sizes = [8, 32], strides = [1, 1]} : vector<8x96xf32> to vector<8x32xf32>
    %10 = vector.shape_cast %9 : vector<8x32xf32> to vector<8x4x8xf32>
    %11 = vector.extract_strided_slice %6 {offsets = [0, 64], sizes = [8, 32], strides = [1, 1]} : vector<8x96xf32> to vector<8x32xf32>
    %12 = vector.shape_cast %11 : vector<8x32xf32> to vector<8x4x8xf32>
    %13 = tpu.transpose %8, [1, 0, 2] : vector<8x4x8xf32> -> vector<4x8x8xf32>
    %14 = arith.truncf %13 : vector<4x8x8xf32> to vector<4x8x8xbf16>
    %c0_6 = arith.constant 0 : index
    %c0_7 = arith.constant 0 : index
    %c0_8 = arith.constant 0 : index
    %c0_9 = arith.constant 0 : index
    %15 = vector.load %arg5[%c0_6, %c0_7, %c0_8, %c0_9] : memref<1x4x8x8xbf16, #tpu.memory_space<vmem>>, vector<1x4x8x8xbf16>
    %16 = vector.shape_cast %15 : vector<1x4x8x8xbf16> to vector<4x8x8xbf16>
    %17 = vector.shape_cast %14 : vector<4x8x8xbf16> to vector<1x4x8x8xbf16>
    tpu.vector_store %arg5[%c0_6, %c0_7, %c0_8, %c0_9], %17 {strides = array<i32>} : memref<1x4x8x8xbf16, #tpu.memory_space<vmem>>, vector<1x4x8x8xbf16>,
    %18 = tpu.transpose %10, [1, 2, 0] : vector<8x4x8xf32> -> vector<4x8x8xf32>
    %19 = arith.truncf %18 : vector<4x8x8xf32> to vector<4x8x8xbf16>
    %c0_10 = arith.constant 0 : index
    %c0_11 = arith.constant 0 : index
    %c0_12 = arith.constant 0 : index
    %c0_13 = arith.constant 0 : index
    %20 = vector.load %arg6[%c0_10, %c0_11, %c0_12, %c0_13] : memref<1x4x8x8xbf16, #tpu.memory_space<vmem>>, vector<1x4x8x8xbf16>
    %21 = vector.shape_cast %20 : vector<1x4x8x8xbf16> to vector<4x8x8xbf16>
    %22 = vector.shape_cast %19 : vector<4x8x8xbf16> to vector<1x4x8x8xbf16>
    tpu.vector_store %arg6[%c0_10, %c0_11, %c0_12, %c0_13], %22 {strides = array<i32>} : memref<1x4x8x8xbf16, #tpu.memory_space<vmem>>, vector<1x4x8x8xbf16>,
    %23 = tpu.transpose %12, [1, 0, 2] : vector<8x4x8xf32> -> vector<4x8x8xf32>
    %24 = arith.truncf %23 : vector<4x8x8xf32> to vector<4x8x8xbf16>
    %c0_14 = arith.constant 0 : index
    %c0_15 = arith.constant 0 : index
    %c0_16 = arith.constant 0 : index
    %c0_17 = arith.constant 0 : index
    %25 = vector.load %arg7[%c0_14, %c0_15, %c0_16, %c0_17] : memref<1x4x8x8xbf16, #tpu.memory_space<vmem>>, vector<1x4x8x8xbf16>
    %26 = vector.shape_cast %25 : vector<1x4x8x8xbf16> to vector<4x8x8xbf16>
    %27 = vector.shape_cast %24 : vector<4x8x8xbf16> to vector<1x4x8x8xbf16>
    tpu.vector_store %arg7[%c0_14, %c0_15, %c0_16, %c0_17], %27 {strides = array<i32>} : memref<1x4x8x8xbf16, #tpu.memory_space<vmem>>, vector<1x4x8x8xbf16>,
    return
  }
  func.func @transform_0(%arg0: i32, %arg1: i32) -> (i32, i32, i32) {
    %c0_i32 = arith.constant 0 : i32
    %c0_i32_0 = arith.constant 0 : i32
    return %arg0, %arg1, %c0_i32 : i32, i32, i32
  }
  func.func @transform_1(%arg0: i32, %arg1: i32) -> (i32, i32) {
    %c0_i32 = arith.constant 0 : i32
    %c0_i32_0 = arith.constant 0 : i32
    %c0_i32_1 = arith.constant 0 : i32
    return %c0_i32, %c0_i32_0 : i32, i32
  }
  func.func @transform_2(%arg0: i32, %arg1: i32) -> (i32, i32) {
    %c0_i32 = arith.constant 0 : i32
    %c0_i32_0 = arith.constant 0 : i32
    %c0_i32_1 = arith.constant 0 : i32
    return %c0_i32, %c0_i32_0 : i32, i32
  }
  func.func @transform_3(%arg0: i32, %arg1: i32) -> (i32, i32, i32, i32) {
    %c0_i32 = arith.constant 0 : i32
    %c0_i32_0 = arith.constant 0 : i32
    %c0_i32_1 = arith.constant 0 : i32
    return %arg0, %c0_i32, %arg1, %c0_i32_0 : i32, i32, i32, i32
  }
  func.func @transform_4(%arg0: i32, %arg1: i32) -> (i32, i32, i32, i32) {
    %c0_i32 = arith.constant 0 : i32
    %c0_i32_0 = arith.constant 0 : i32
    %c0_i32_1 = arith.constant 0 : i32
    return %arg0, %c0_i32, %c0_i32_0, %arg1 : i32, i32, i32, i32
  }
  func.func @transform_5(%arg0: i32, %arg1: i32) -> (i32, i32, i32, i32) {
    %c0_i32 = arith.constant 0 : i32
    %c0_i32_0 = arith.constant 0 : i32
    %c0_i32_1 = arith.constant 0 : i32
    return %arg0, %c0_i32, %arg1, %c0_i32_0 : i32, i32, i32, i32
  }
}

</mosaic_0001>

<bundles_post_ra>
// kernel: tpu_custom_call.1
= control target key start
LH: loop header
LB: loop body
LE: loop exit
PB: predicated region body
PF: predicated region fallthrough
CT: control target
= control target key end

     0   :  { %11 = vsyncpa [#allocation3], 0  ;;  %s2519_s0 = inlined_call_operand.hbm [shape: bf16[2,8,32], index: 0, kind: input, shape index: {}]   ;;  %s2520_s1 = inlined_call_operand.hbm [shape: bf16[32,96], index: 1, kind: input, shape index: {}]   ;;  %s2521_s2 = inlined_call_operand.vmem [shape: f32[1,96], index: 2, kind: input, shape index: {}]   ;;  %s2522_s3 = inlined_call_operand.hbm [shape: bf16[2,4,8,8], index: 3, kind: output, shape index: {0}]   ;;  %s2523_s4 = inlined_call_operand.hbm [shape: bf16[2,4,8,8], index: 4, kind: output, shape index: {1}]   ;;  %s2524_s5 = inlined_call_operand.hbm [shape: bf16[2,4,8,8], index: 5, kind: output, shape index: {2}]  }
   0x1   :  { %13 = vsyncpa [#allocation3 + $0x1], 0 }
   0x2   :  { %14 = vsyncpa [#allocation6], 0 }
   0x3   :  { %15 = vsyncpa [#allocation4], 0 }
   0x4   :  { %17 = vsyncpa [#allocation4 + $0x1], 0 }
   0x5   :  { %18 = vsyncpa [#allocation9], 0 }
   0x6   :  { %20 = vsyncpa [#allocation9 + $0x1], 0  ;;  %s2092_s18 = smov 0   ;;  %s2094_s19 = smov 0  }
   0x7   :  { %s2096_s20 = smov 0   ;;  %s2098_s21 = smov 0  }
   0x8   :  { %s2100_s22 = smov 0   ;;  %s2102_s23 = smov 0  }
   0x9 LB: > { %s2123_s24 = sadd.s32 4294967295, %s2043_s23   ;;  %s2528_s25 = sadd.s32 4294967294, %s2043_s23   ;;  %s2043_s23 = sphi %s2102_s23, %s26_s23   ;;  %s2039_s22 = sphi %s2100_s22, %s2548_s22   ;;  %s2035_s21 = sphi %s2098_s21, %s2547_s21   ;;  %s2031_s20 = sphi %s2096_s20, %s2546_s20   ;;  %s2027_s19 = sphi %s2094_s19, %s2545_s19   ;;  %s2023_s18 = sphi %s2092_s18, %s2544_s18  }
   0xa   : > { %p60_p0 = scmp.ne.s32.totalorder %s2027_s19, %s2023_s18  ;;  %p2525_p1 = scmp.eq.s32.totalorder %s2123_s24, 0 }
   0xb   : > { %p134_p3 = scmp.eq.s32.totalorder %s2528_s25, 1  ;;  %p1698_p5 = scmp.ge.s32.totalorder %s2043_s23, 1 }
   0xc   : > { %p2134_p4 = por %p2525_p1, %p60_p0  ;;  %p197_p7 = scmp.lt.s32.totalorder %s2043_s23, 3 }
   0xd   : > { %p2139_p6 = por %p134_p3, %p60_p0  ;;  %s2045_s29 = smov [#allocation5]  }
   0xe   : > { %s2529_s26 = scalar_select %p2134_p4, 1, 0 }
   0xf   : > { %s2530_s27 = scalar_select %p2139_p6, 1, 0 }
  0x10   : > { %p2144_p8 = pnand %p1698_p5, %p197_p7  ;;  %s209_s30 = sshll.u32 %s2045_s29, 4  ;;  %s210_s30 = int_to_ptr.vmem [resolvable:$true] %s209_s30 }
  0x11   : > { %s38_s7 = sadd.s32 1, %s2039_s22  ;;  %s1839_s10 = scalar_lea.hbm %s2520_s1, 256 }
  0x12   : > { %s2531_s28 = scalar_select %p2144_p8, 1, 0 }
  0x13   : > { %p1754_p9 = pneg %p2144_p8  ;;  %p1840_p12 = scmp.ne.s32.totalorder %s2520_s1, %s1839_s10 }
  0x14   : > { %p1846_p5 = scmp.lt.u32.totalorder %s1839_s10, %s2520_s1 }
  0x15   : > { %p2153_p11 = pnand %p1754_p9, %p2525_p1 }
  0x17   : > { %p1841_p13 = pneg %p2153_p11 }
  0x19   : > { %p1842_p0 = pnand %p1841_p13, %p1840_p12 }
  0x1b   : > { %p1843_p3 = pneg %p1842_p0 }
  0x1d   : > { %p1848_p7 = pnand %p1846_p5, %p1843_p3 }
  0x1f   : > { %1851 = shalt.err (!%p1848_p7)
}
  0x20   : > { %s1852_s15 = scalar_lea.vmem %s210_s30, 256  ;;  %p1860_p2 = scmp.lt.s32.totalorder %s210_s30, %s210_s30 }
  0x21   : > { %p1853_p9 = scmp.ne.s32.totalorder %s210_s30, %s1852_s15  ;;  %p1861_p6 = scmp.lt.s32.totalorder %s1852_s15, %s1852_s15 }
  0x23   : > { %p1855_p10 = pnand %p1853_p9, %p1841_p13  ;;  %p1862_p4 = por %p1861_p6, %p1860_p2 }
  0x25   : > { %p1856_p1 = pneg %p1855_p10 }
  0x27   : > { %p1863_p8 = pnand %p1862_p4, %p1856_p1 }
  0x29   : > { %1866 = shalt.err (!%p1863_p8)
}
  0x2a   : > { %s2046_s16 = smov 64   ;;  %s2047_s17 = smov 4  }
  0x2b   : > { %1757 = dma.hbm_to_vmem [thread:$0]  (!%p2153_p11), %s2520_s1, 256, %s210_s30, [#allocation6], %s2046_s16, %s2046_s16, %s2047_s17  }
  0x2c   : > { %p40_p1 = scmp.ge.s32.totalorder %s38_s7, 2  ;;  %s47_s9 = sadd.s32 1, %s2031_s20 }
  0x2d   : > { %p54_p2 = scmp.ne.s32.totalorder %s2031_s20, %s2027_s19  ;;  %p55_p4 = scmp.eq.s32.totalorder %s2043_s23, 0 }
  0x2e   : > { %s2550_s7 = smov (%p40_p1, %s38_s7), 0  ;;  %p2534_p8 = scmp.eq.s32.totalorder %s2123_s24, 1 }
  0x2f   : > { %p2180_p6 = por %p55_p4, %p54_p2  ;;  %s42_s6 = ssub.s32 %s2039_s22, %s2550_s7 }
  0x30   : > { %p2186_p10 = por %p2534_p8, %p54_p2  ;;  %p1773_p12 = scmp.lt.s32.totalorder %s2043_s23, 2 }
  0x31   : > { %p45_p11 = scmp.eq.s32.totalorder %s42_s6, 0  ;;  %s226_s30 = sand.u32 1, %s2031_s20  }
  0x32   : > { %s1701_s12 = sshll.u32 %s226_s30, 2  ;;  %s1702_s14 = sshll.u32 %s2039_s22, 6 }
  0x33   : > { %s2195_s13 = scalar_select %p45_p11, %s2031_s20, %s47_s9  }
  0x34   : > { %s2201_s17 = scalar_lea.hbm %s2519_s0, %s1702_s14  ;;  %s230_s29 = scalar_lea.vmem [#allocation2], %s1701_s12 }
  0x35   : > { %s238_s8 = sshll.u32 %s230_s29, 4  ;;  %p2207_p13 = pnand %p1773_p12, %p2180_p6  ;;  %s2203_s8 = int_to_ptr.vmem [resolvable:$true] %s238_s8 }
  0x36   : > { %s227_s9 = scalar_lea.sflag [#allocation3], %s226_s30  ;;  %s1867_s25 = scalar_lea.hbm %s2201_s17, 64 }
  0x37   : > { %p1868_p0 = scmp.ne.s32.totalorder %s2201_s17, %s1867_s25  ;;  %p1869_p3 = pneg %p2207_p13 }
  0x38   : > { %s1872_s15 = scalar_lea.hbm %s2519_s0, 128  ;;  %p1873_p9 = scmp.lt.u32.totalorder %s2201_s17, %s2519_s0 }
  0x39   : > { %p1870_p5 = pnand %p1869_p3, %p1868_p0  ;;  %p1874_p1 = scmp.lt.u32.totalorder %s1872_s15, %s1867_s25 }
  0x3a   : > { %p1876_p4 = scmp.lt.u32.totalorder %s1867_s25, %s2201_s17 }
  0x3b   : > { %p1871_p7 = pneg %p1870_p5  ;;  %p1875_p2 = por %p1874_p1, %p1873_p9 }
  0x3d   : > { %p1877_p6 = por %p1876_p4, %p1875_p2 }
  0x3f   : > { %p1878_p8 = pnand %p1877_p6, %p1871_p7 }
  0x41   : > { %1881 = shalt.err (!%p1878_p8)
}
  0x42   : > { %s1882_s30 = scalar_lea.vmem %s2203_s8, 64  ;;  %s2048_s29 = smov [#allocation2]  }
  0x43   : > { %p1883_p12 = scmp.ne.s32.totalorder %s2203_s8, %s1882_s30  ;;  %s1887_s12 = sshll.u32 %s2048_s29, 4  ;;  %s1888_s12 = int_to_ptr.vmem [resolvable:$false] %s1887_s12 }
  0x44   : > { %s1889_s14 = scalar_lea.vmem %s1888_s12, 128  ;;  %p1890_p5 = scmp.lt.s32.totalorder %s2203_s8, %s1888_s12 }
  0x45   : > { %p1885_p11 = pnand %p1883_p12, %p1869_p3  ;;  %p1891_p9 = scmp.lt.s32.totalorder %s1889_s14, %s1882_s30 }
  0x47   : > { %p1886_p0 = pneg %p1885_p11  ;;  %p1892_p1 = por %p1891_p9, %p1890_p5 }
  0x49   : > { %p1893_p2 = pnand %p1892_p1, %p1886_p0 }
  0x4b   : > { %1896 = shalt.err (!%p1893_p2)
}
  0x4c   : > { %1761 = dma.hbm_to_vmem [thread:$0]  (!%p2207_p13), %s2201_s17, 64, %s2203_s8, %s227_s9  }
  0x4d   : > { %p2537_p7 = scmp.ne.s32.totalorder %s2531_s28, 0 }
  0x4e   : > { %s2239_s25 = sand.u32 (!%p2537_p7), 1, %s2027_s19   ;;  %p2538_p3 = scmp.ne.s32.totalorder (!%p2537_p7), %s2529_s26, 0 }
  0x4f   : > { %247 = sbr.rel (%p2537_p7) target bundleno = 904 (0x388), region = 32  ;;  %s1704_s15 = sshll.u32 (!%p2537_p7), %s2239_s25, 2 }
  0x50   : > { %s250_s10 = scalar_lea.sflag (!%p2537_p7), [#allocation3], %s2239_s25  ;;  %s253_s16 = scalar_lea.vmem (!%p2537_p7), [#allocation2], %s1704_s15 }
  0x56   : > { %2006 = dma.done.wait (%p2538_p3), %s250_s10, 64  }
  0x57   : > { %2008 = vsyncadd (%p2538_p3), %s250_s10, 4294967232  ;;  %p2539_p4 = scmp.eq.s32.totalorder %s2123_s24, 0 }
  0x59   : > { %2010 = dma.done.wait (%p2539_p4), [#allocation6], 256   ;;  %p2540_p13 = pmov %p2539_p4 }
  0x5a   : > { %v2049_v0 = vmov 0.0   ;;  %vm2050_vm0 = vmmov 0   ;;  %v1837_v1 = vld [vmem:[#allocation5] sm:$0xff]   ;;  %v1838_v2 = vld [vmem:[#allocation5 + $0x8] sm:$0xff]   ;;  %v295_v3 = vld [vmem:[%s253_s16] sm:$0xf]  ;;  %v378_v12 = vlaneseq }
  0x5b   : > { %2012 = vsyncadd (%p2540_p13), [#allocation6], 4294967040  ;;  %1734 = vmatprep.subr.bf16.mxu0 %v2049_v0  ;;  %1738 = vmatprep.mubr.msk.bf16.mxu0 %vm2050_vm0, %v2049_v0  ;;  %vm319_vm1 = vcmask 261120   ;;  %v1709_v4 = vld [vmem:[%s2521_s2] ss:$0 sm:$0xff]  ;;  %s2051_s17 = smov 104  }
  0x5c   : > { %1735 = vmatpush3.bf16.msra.mxu0 %v1837_v1  ;;  %s2052_s8 = smov 120   ;;  %s2053_s6 = smov 96   ;;  %v2056_v10 = vmov 1983009808   ;;  %v2057_v13 = vmov 1934713408  }
  0x5d   : > { %1736 = vmatprep.subr.bf16.mxu0 %v2049_v0  ;;  %s2054_s9 = smov 112   ;;  %s2055_s30 = smov 64   ;;  %v376_v11 = vunpack.c.l.s4 %v2056_v10  ;;  %v408_v14 = vunpack.c.l.s4 %v2057_v13  ;;  %v379_v16 = vshrl.u32 %v378_v12, 7  ;;  %vm673_vm2 = vcmask 60416  }
  0x5e   : > { %s2294_s29 = sshll.u32 %s2239_s25, 4  ;;  %s2358_s14 = sshll.u32 %s2035_s21, 8 }
  0x5f   : > { %v377_v15 = vunpack.c.0.s8 %v376_v11  ;;  %v409_v19 = vunpack.c.0.s8 %v408_v14  ;;  %s2297_s12 = scalar_lea.vmem [#allocation7], %s2294_s29  ;;  %s2368_s21 = scalar_lea.hbm %s2522_s3, %s2358_s14 }
  0x60   : > { %1737 = vmatpush3.bf16.msra.mxu0 %v1838_v2  ;;  %s1503_s16 = sshll.u32 %s2297_s12, 4  ;;  %s1479_s26 = scalar_lea.sflag [#allocation4], %s2239_s25  ;;  %s2371_s16 = int_to_ptr.vmem [resolvable:$true] %s1503_s16 }
  0x61   : > { %v2263_v20 = vsub.s32 %v377_v15, %v379_v16  ;;  %v2275_v26 = vsub.s32 %v409_v19, %v379_v16  ;;  %s1897_s28 = scalar_lea.vmem %s2371_s16, 256 }
  0x62   : > { %p1898_p6 = scmp.ne.s32.totalorder %s2371_s16, %s1897_s28 }
  0x63   : > { %1739 = vmatmul.mubr.msk.bf16.vlgmr.msra.gmra.mrb[0].mxu0 %vm319_vm1, %v295_v3 }
  0x64   : > { %p1899_p8 = pnand %p1898_p6, %p2186_p10 }
  0x66   : > { %p1900_p12 = pneg %p1899_p8 }
 0x136   : > { %v357_v5 = vpop.f32.mrb[0].mxu0 }
 0x137   : > { %v358_v6 = vadd.f32 %v1709_v4, %v357_v5  ;;  %v1740_v7 = vpop.f32.mrb[1].mxu0 }
 0x138   : > { %v360_v8 = vpop.f32.mrb[2].mxu0 }
 0x139   : > { %370 = vrot.lane.b32.xlu1 %v358_v6, %s2051_s17  ;;  %364 = vrot.lane.b32.xlu0 %v358_v6, %s2052_s8  ;;  %v1741_v9 = vpop.f32.mrb[3].mxu0  ;;  %s2058_s17 = smov [#allocation7]  }
 0x13a   : > { %s1901_s8 = sshll.u32 %s2058_s17, 4  ;;  %s1902_s8 = int_to_ptr.vmem [resolvable:$false] %s1901_s8 }
 0x13b   : > { %p1904_p11 = scmp.lt.s32.totalorder %s2371_s16, %s1902_s8 }
 0x13d   : > { %441 = vrot.lane.b32.xlu1 %v358_v6, %s2053_s6  ;;  %367 = vrot.lane.b32.xlu0 %v358_v6, %s2054_s9 }
 0x141   : > { %521 = vrot.lane.b32.xlu1 %v358_v6, %s2055_s30 }
 0x1ab   : > { %v2258_v17 = vpop.permute.xlu1 %370  ;;  %v2260_v18 = vpop.permute.xlu0 %364 }
 0x1ac   : > { %443 = vrot.lane.b32.xlu0 %v2260_v18, %s2053_s6  ;;  %v389_v21 = vcombine.low %v2260_v18, %v2258_v17  ;;  %v390_v22 = vcombine.high %v2260_v18, %v2258_v17 }
 0x1ae   : > { %v397_v27 = vrot.slane %v389_v21, %v2263_v20  ;;  %v404_v28 = vrot.slane %v390_v22, %v2263_v20 }
 0x1af   : > { %v2269_v23 = vpop.permute.xlu0 %367  ;;  %v442_v63 = vpop.permute.xlu1 %441 }
 0x1b0   : > { %v373_v24 = vcombine.low %v358_v6, %v2269_v23  ;;  %v374_v25 = vcombine.high %v358_v6, %v2269_v23  ;;  %447 = vrot.lane.b32.xlu0 %v2258_v17, %s2053_s6  ;;  %445 = vrot.lane.b32.xlu1 %v2269_v23, %s2053_s6  ;;  %s1903_s6 = scalar_lea.vmem %s1902_s8, 512 }
 0x1b1   : > { %p1905_p0 = scmp.lt.s32.totalorder %s1903_s6, %s1897_s28 }
 0x1b2   : > { %v381_v29 = vrot.slane %v373_v24, %v2263_v20  ;;  %v388_v30 = vrot.slane %v374_v25, %v2263_v20 }
 0x1b3   : > { %v2307_v1 = vpop.permute.xlu1 %521  ;;  %p1906_p5 = por %p1905_p0, %p1904_p11 }
 0x1b4   : > { %v405_v31 = vcombine.low %v381_v29, %v397_v27  ;;  %v406_v32 = vcombine.high %v381_v29, %v397_v27  ;;  %v421_v33 = vcombine.low %v388_v30, %v404_v28  ;;  %v422_v34 = vcombine.high %v388_v30, %v404_v28 }
 0x1b5   : > { %p1907_p9 = pnand %p1906_p5, %p1900_p12 }
 0x1b6   : > { %v413_v35 = vrot.slane %v405_v31, %v2275_v26  ;;  %v420_v36 = vrot.slane %v406_v32, %v2275_v26  ;;  %v429_v37 = vrot.slane %v421_v33, %v2275_v26  ;;  %v436_v38 = vrot.slane %v422_v34, %v2275_v26 }
 0x1b8   : > { %v601_v39 = vcombine.low %v413_v35, %v420_v36  ;;  %v1713_v40 = vcombine.high %v413_v35, %v420_v36  ;;  %v617_v41 = vcombine.low %v429_v37, %v436_v38  ;;  %v1714_v42 = vcombine.high %v429_v37, %v436_v38 }
 0x1ba   : > { %v608_v43 = vrot.slane %v601_v39, %v2263_v20  ;;  %v616_v44 = vrot.slane %v1713_v40, %v2263_v20  ;;  %v624_v45 = vrot.slane %v617_v41, %v2263_v20  ;;  %v632_v46 = vrot.slane %v1714_v42, %v2263_v20 }
 0x1bc   : > { %v633_v47 = vcombine.low %v608_v43, %v616_v44  ;;  %v634_v48 = vcombine.high %v608_v43, %v616_v44  ;;  %v649_v49 = vcombine.low %v624_v45, %v632_v46  ;;  %v650_v50 = vcombine.high %v624_v45, %v632_v46 }
 0x1be   : > { %v641_v51 = vrot.slane %v633_v47, %v2275_v26  ;;  %v648_v52 = vrot.slane %v634_v48, %v2275_v26  ;;  %v657_v53 = vrot.slane %v649_v49, %v2275_v26  ;;  %v664_v54 = vrot.slane %v650_v50, %v2275_v26 }
 0x1c0   : > { %v665_v55 = vcombine.low %v641_v51, %v657_v53  ;;  %v666_v56 = vcombine.high %v641_v51, %v657_v53  ;;  %v667_v57 = vcombine.low %v648_v52, %v664_v54  ;;  %v668_v58 = vcombine.high %v648_v52, %v664_v54 }
 0x1c2   : > { %v669_v59 = vpack.c.bf16 %v665_v55, %v665_v55  ;;  %v670_v60 = vpack.c.bf16 %v666_v56, %v666_v56  ;;  %v671_v61 = vpack.c.bf16 %v667_v57, %v667_v57  ;;  %v672_v62 = vpack.c.bf16 %v668_v58, %v668_v58 }
 0x1c4   : > { %674 = vst.msk [vmem:[%s2297_s12] sm:$0xf] %vm673_vm2, %v669_v59  ;;  %675 = vst.msk [vmem:[%s2297_s12 + $0x4] sm:$0xf] %vm673_vm2, %v670_v60 }
 0x1c5   : > { %676 = vst.msk [vmem:[%s2297_s12 + $0x8] sm:$0xf] %vm673_vm2, %v671_v61  ;;  %677 = vst.msk [vmem:[%s2297_s12 + $0xc] sm:$0xf] %vm673_vm2, %v672_v62 }
 0x21e   : > { %v444_v2 = vpop.permute.xlu0 %443 }
 0x222   : > { %v446_v3 = vpop.permute.xlu1 %445  ;;  %v448_v4 = vpop.permute.xlu0 %447 }
 0x223   : > { %v453_v5 = vcombine.low %v442_v63, %v446_v3  ;;  %v454_v6 = vcombine.high %v442_v63, %v446_v3  ;;  %v469_v7 = vcombine.low %v444_v2, %v448_v4  ;;  %v470_v8 = vcombine.high %v444_v2, %v448_v4 }
 0x225   : > { %v461_v9 = vrot.slane %v453_v5, %v2263_v20  ;;  %v468_v10 = vrot.slane %v454_v6, %v2263_v20  ;;  %v477_v11 = vrot.slane %v469_v7, %v2263_v20  ;;  %v484_v12 = vrot.slane %v470_v8, %v2263_v20 }
 0x227   : > { %v486_v13 = vcombine.high %v461_v9, %v477_v11  ;;  %v485_v14 = vcombine.low %v461_v9, %v477_v11  ;;  %v501_v19 = vcombine.low %v468_v10, %v484_v12  ;;  %v502_v24 = vcombine.high %v468_v10, %v484_v12 }
 0x229   : > { %v500_v15 = vrot.slane %v486_v13, %v2275_v26  ;;  %v493_v16 = vrot.slane %v485_v14, %v2275_v26  ;;  %v509_v21 = vrot.slane %v501_v19, %v2275_v26  ;;  %v516_v25 = vrot.slane %v502_v24, %v2275_v26 }
 0x22b   : > { %742 = vxpose.xlu0.b32.start.end [1/1] (short) (narrow) %v500_v15, 8  ;;  %678 = vxpose.xlu1.b32.start.end [1/1] (short) (narrow) %v493_v16, 8  ;;  %v517_v22 = vcombine.high %v493_v16, %v2049_v0  ;;  %v518_v27 = vcombine.high %v500_v15, %v2049_v0  ;;  %v519_v28 = vcombine.high %v509_v21, %v2049_v0 }
 0x22c   : > { %v520_v29 = vcombine.high %v516_v25, %v2049_v0 }
 0x22f   : > { %806 = vxpose.xlu1.b32.start.end [1/1] (short) (narrow) %v509_v21, 8  ;;  %710 = vxpose.xlu0.b32.start.end [1/1] (short) (narrow) %v517_v22, 8 }
 0x233   : > { %870 = vxpose.xlu1.b32.start.end [1/1] (short) (narrow) %v516_v25, 8  ;;  %774 = vxpose.xlu0.b32.start.end [1/1] (short) (narrow) %v518_v27, 8 }
 0x237   : > { %838 = vxpose.xlu0.b32.start.end [1/1] (short) (narrow) %v519_v28, 8 }
 0x23b   : > { %902 = vxpose.xlu0.b32.start.end [1/1] (short) (narrow) %v520_v29, 8 }
 0x251   : > { %525 = vrot.lane.b32.xlu1 %v2269_v23, %s2055_s30 }
 0x255   : > { %527 = vrot.lane.b32.xlu1 %v2258_v17, %s2055_s30 }
 0x264   : > { %523 = vrot.lane.b32.xlu0 %v2260_v18, %s2055_s30 }
 0x2ab   : > { %v758_v30 = vpop.trf.xlu0  ;;  %v694_v31 = vpop.trf.xlu1 }
 0x2ac   : > { %v934_v38 = vcombine.low %v694_v31, %v758_v30  ;;  %v935_v42 = vcombine.high %v694_v31, %v758_v30 }
 0x2ae   : > { %v942_v17 = vrot.slane %v934_v38, %v2263_v20  ;;  %v949_v50 = vrot.slane %v935_v42, %v2263_v20 }
 0x2af   : > { %v726_v32 = vpop.trf.xlu0  ;;  %v822_v33 = vpop.trf.xlu1 }
 0x2b3   : > { %v790_v34 = vpop.trf.xlu0  ;;  %v886_v36 = vpop.trf.xlu1 }
 0x2b4   : > { %v950_v35 = vcombine.low %v726_v32, %v790_v34  ;;  %v951_v0 = vcombine.high %v726_v32, %v790_v34  ;;  %v966_v39 = vcombine.low %v822_v33, %v886_v36  ;;  %v967_v23 = vcombine.high %v822_v33, %v886_v36 }
 0x2b6   : > { %v958_v40 = vrot.slane %v950_v35, %v2263_v20  ;;  %v965_v44 = vrot.slane %v951_v0, %v2263_v20  ;;  %v974_v45 = vrot.slane %v966_v39, %v2263_v20  ;;  %v981_v47 = vrot.slane %v967_v23, %v2263_v20 }
 0x2b7   : > { %v854_v37 = vpop.trf.xlu0 }
 0x2b8   : > { %v998_v46 = vcombine.low %v942_v17, %v958_v40  ;;  %v999_v56 = vcombine.high %v942_v17, %v958_v40  ;;  %v1014_v57 = vcombine.low %v949_v50, %v965_v44  ;;  %v1015_v3 = vcombine.high %v949_v50, %v965_v44 }
 0x2ba   : > { %v1006_v54 = vrot.slane %v998_v46, %v2275_v26  ;;  %v1013_v63 = vrot.slane %v999_v56, %v2275_v26  ;;  %v1022_v2 = vrot.slane %v1014_v57, %v2275_v26  ;;  %v1029_v7 = vrot.slane %v1015_v3, %v2275_v26 }
 0x2bb   : > { %v918_v41 = vpop.trf.xlu0 }
 0x2bc   : > { %v982_v43 = vcombine.low %v854_v37, %v918_v41  ;;  %v983_v18 = vcombine.high %v854_v37, %v918_v41 }
 0x2be   : > { %v990_v48 = vrot.slane %v982_v43, %v2263_v20  ;;  %v997_v49 = vrot.slane %v983_v18, %v2263_v20 }
 0x2c0   : > { %v1030_v51 = vcombine.low %v974_v45, %v990_v48  ;;  %v1031_v52 = vcombine.high %v974_v45, %v990_v48  ;;  %v1046_v53 = vcombine.low %v981_v47, %v997_v49  ;;  %v1047_v58 = vcombine.high %v981_v47, %v997_v49 }
 0x2c2   : > { %v1038_v55 = vrot.slane %v1030_v51, %v2275_v26  ;;  %v1045_v61 = vrot.slane %v1031_v52, %v2275_v26  ;;  %v1054_v62 = vrot.slane %v1046_v53, %v2275_v26  ;;  %v1061_v6 = vrot.slane %v1047_v58, %v2275_v26 }
 0x2c3   : > { %v526_v10 = vpop.permute.xlu1 %525 }
 0x2c4   : > { %v1063_v59 = vcombine.high %v1006_v54, %v1038_v55  ;;  %v1062_v60 = vcombine.low %v1006_v54, %v1038_v55  ;;  %v1064_v4 = vcombine.low %v1013_v63, %v1045_v61  ;;  %v1066_v5 = vcombine.low %v1022_v2, %v1054_v62 }
 0x2c5   : > { %v1065_v8 = vcombine.high %v1013_v63, %v1045_v61  ;;  %v1068_v9 = vcombine.low %v1029_v7, %v1061_v6  ;;  %v1067_v11 = vcombine.high %v1022_v2, %v1054_v62  ;;  %v1069_v12 = vcombine.high %v1029_v7, %v1061_v6 }
 0x2c6   : > { %1102 = vxpose.xlu0.b32.start.end [1/1] (short) (narrow) %v1063_v59, 8  ;;  %1070 = vxpose.xlu1.b32.start.end [1/1] (short) (narrow) %v1062_v60, 8  ;;  %v533_v13 = vcombine.low %v2307_v1, %v526_v10  ;;  %v534_v14 = vcombine.high %v2307_v1, %v526_v10 }
 0x2c7   : > { %v528_v15 = vpop.permute.xlu1 %527 }
 0x2c8   : > { %v541_v22 = vrot.slane %v533_v13, %v2263_v20  ;;  %v548_v24 = vrot.slane %v534_v14, %v2263_v20 }
 0x2ca   : > { %1134 = vxpose.xlu0.b32.start.end [1/1] (short) (narrow) %v1064_v4, 8  ;;  %1198 = vxpose.xlu1.b32.start.end [1/1] (short) (narrow) %v1066_v5, 8 }
 0x2ce   : > { %1166 = vxpose.xlu0.b32.start.end [1/1] (short) (narrow) %v1065_v8, 8  ;;  %1262 = vxpose.xlu1.b32.start.end [1/1] (short) (narrow) %v1068_v9, 8 }
 0x2d2   : > { %1230 = vxpose.xlu0.b32.start.end [1/1] (short) (narrow) %v1067_v11, 8 }
 0x2d6   : > { %1294 = vxpose.xlu0.b32.start.end [1/1] (short) (narrow) %v1069_v12, 8  ;;  %v524_v16 = vpop.permute.xlu0 %523 }
 0x2d7   : > { %v549_v19 = vcombine.low %v524_v16, %v528_v15  ;;  %v550_v21 = vcombine.high %v524_v16, %v528_v15 }
 0x2d9   : > { %v557_v25 = vrot.slane %v549_v19, %v2263_v20  ;;  %v564_v27 = vrot.slane %v550_v21, %v2263_v20 }
 0x2db   : > { %v565_v28 = vcombine.low %v541_v22, %v557_v25  ;;  %v566_v29 = vcombine.high %v541_v22, %v557_v25  ;;  %v581_v30 = vcombine.low %v548_v24, %v564_v27  ;;  %v582_v31 = vcombine.high %v548_v24, %v564_v27 }
 0x2dd   : > { %v573_v32 = vrot.slane %v565_v28, %v2275_v26  ;;  %v580_v1 = vrot.slane %v566_v29, %v2275_v26  ;;  %v589_v33 = vrot.slane %v581_v30, %v2275_v26  ;;  %v596_v34 = vrot.slane %v582_v31, %v2275_v26 }
 0x2df   : > { %v1402_v35 = vcombine.low %v573_v32, %v580_v1  ;;  %v1715_v36 = vcombine.high %v573_v32, %v580_v1  ;;  %v1418_v37 = vcombine.low %v589_v33, %v596_v34  ;;  %v1716_v38 = vcombine.high %v589_v33, %v596_v34 }
 0x2e1   : > { %v1409_v0 = vrot.slane %v1402_v35, %v2263_v20  ;;  %v1417_v39 = vrot.slane %v1715_v36, %v2263_v20  ;;  %v1425_v40 = vrot.slane %v1418_v37, %v2263_v20  ;;  %v1433_v23 = vrot.slane %v1716_v38, %v2263_v20 }
 0x2e3   : > { %v1434_v41 = vcombine.low %v1409_v0, %v1417_v39  ;;  %v1435_v42 = vcombine.high %v1409_v0, %v1417_v39  ;;  %v1450_v17 = vcombine.low %v1425_v40, %v1433_v23  ;;  %v1451_v43 = vcombine.high %v1425_v40, %v1433_v23 }
 0x2e5   : > { %v1442_v18 = vrot.slane %v1434_v41, %v2275_v26  ;;  %v1449_v44 = vrot.slane %v1435_v42, %v2275_v26  ;;  %v1458_v45 = vrot.slane %v1450_v17, %v2275_v26  ;;  %v1465_v46 = vrot.slane %v1451_v43, %v2275_v26 }
 0x2e7   : > { %v1466_v47 = vcombine.low %v1442_v18, %v1458_v45  ;;  %v1467_v48 = vcombine.high %v1442_v18, %v1458_v45  ;;  %v1468_v49 = vcombine.low %v1449_v44, %v1465_v46  ;;  %v1469_v50 = vcombine.high %v1449_v44, %v1465_v46 }
 0x2e9   : > { %v1470_v51 = vpack.c.bf16 %v1466_v47, %v1466_v47  ;;  %v1471_v52 = vpack.c.bf16 %v1467_v48, %v1467_v48  ;;  %v1472_v53 = vpack.c.bf16 %v1468_v49, %v1468_v49  ;;  %v1473_v54 = vpack.c.bf16 %v1469_v50, %v1469_v50 }
 0x2ea   : > { %1910 = shalt.err (!%p1907_p9)
}
 0x2eb   : > { %s1911_s9 = scalar_lea.hbm %s2368_s21, 256  ;;  %s1915_s10 = scalar_lea.hbm %s2522_s3, 512 }
 0x2ec   : > { %p1912_p1 = scmp.ne.s32.totalorder %s2368_s21, %s1911_s9  ;;  %p1916_p3 = scmp.lt.u32.totalorder %s2368_s21, %s2522_s3 }
 0x2ed   : > { %p1917_p4 = scmp.lt.u32.totalorder %s1915_s10, %s1911_s9  ;;  %p1919_p6 = scmp.lt.u32.totalorder %s1911_s9, %s2368_s21 }
 0x2ee   : > { %p1913_p2 = pnand %p1912_p1, %p2186_p10 }
 0x2ef   : > { %p1918_p13 = por %p1917_p4, %p1916_p3 }
 0x2f0   : > { %p1914_p7 = pneg %p1913_p2 }
 0x2f1   : > { %p1920_p8 = por %p1919_p6, %p1918_p13 }
 0x2f3   : > { %p1921_p12 = pnand %p1920_p8, %p1914_p7 }
 0x2f5   : > { %1924 = shalt.err (!%p1921_p12)
}
 0x2f6   : > { %s2059_s28 = smov 4   ;;  %s2401_s6 = scalar_lea.vmem [#allocation10], %s2294_s29 }
 0x2f7   : > { %1748 = dma.vmem_to_hbm [thread:$0]  (%p2186_p10), %s2371_s16, 256, %s2368_s21, %s1479_s26, %s2055_s30, %s2055_s30, %s2059_s28  }
 0x2f8   : > { %1474 = vst.msk [vmem:[%s2401_s6] sm:$0xf] %vm673_vm2, %v1470_v51  ;;  %1475 = vst.msk [vmem:[%s2401_s6 + $0x4] sm:$0xf] %vm673_vm2, %v1471_v52  ;;  %s1483_s25 = sand.u32 1, %s2123_s24   ;;  %s286_s21 = scalar_lea.vmem [#allocation8], %s2294_s29 }
 0x2f9   : > { %1476 = vst.msk [vmem:[%s2401_s6 + $0x8] sm:$0xf] %vm673_vm2, %v1472_v53  ;;  %1477 = vst.msk [vmem:[%s2401_s6 + $0xc] sm:$0xf] %vm673_vm2, %v1473_v54  ;;  %s1520_s16 = sshll.u32 %s286_s21, 4  ;;  %s1537_s26 = sshll.u32 %s2401_s6, 4  ;;  %s2428_s16 = int_to_ptr.vmem [resolvable:$true] %s1520_s16  ;;  %s2436_s26 = int_to_ptr.vmem [resolvable:$true] %s1537_s26 }
 0x2fa   : > { %s2426_s15 = scalar_lea.hbm %s2523_s4, %s2358_s14  ;;  %s2434_s10 = scalar_lea.hbm %s2524_s5, %s2358_s14 }
 0x2fb   : > { %s2442_s17 = scalar_lea.sflag [#allocation9], %s1483_s25  ;;  %s1925_s8 = scalar_lea.vmem %s2428_s16, 256 }
 0x2fc   : > { %p1926_p11 = scmp.ne.s32.totalorder %s2428_s16, %s1925_s8  ;;  %s2060_s6 = smov [#allocation8]  }
 0x2fd   : > { %s1929_s14 = sshll.u32 %s2060_s6, 4  ;;  %s1930_s14 = int_to_ptr.vmem [resolvable:$false] %s1929_s14 }
 0x2fe   : > { %p1927_p0 = pnand %p1926_p11, %p2186_p10  ;;  %s1931_s9 = scalar_lea.vmem %s1930_s14, 512 }
 0x2ff   : > { %p1932_p9 = scmp.lt.s32.totalorder %s2428_s16, %s1930_s14  ;;  %p1933_p1 = scmp.lt.s32.totalorder %s1931_s9, %s1925_s8 }
 0x300   : > { %p1928_p5 = pneg %p1927_p0 }
 0x301   : > { %p1934_p2 = por %p1933_p1, %p1932_p9 }
 0x303   : > { %p1935_p7 = pnand %p1934_p2, %p1928_p5 }
 0x346   : > { %v1118_v55 = vpop.trf.xlu0  ;;  %v1086_v56 = vpop.trf.xlu1 }
 0x34a   : > { %v1150_v57 = vpop.trf.xlu0  ;;  %v1214_v58 = vpop.trf.xlu1 }
 0x34b   : > { %v1326_v63 = vcombine.low %v1086_v56, %v1150_v57 }
 0x34d   : > { %v1333_v5 = vrot.slane %v1326_v63, %v2263_v20 }
 0x34e   : > { %v1182_v59 = vpop.trf.xlu0  ;;  %v1278_v61 = vpop.trf.xlu1 }
 0x34f   : > { %v1334_v60 = vcombine.low %v1118_v55, %v1182_v59  ;;  %v1342_v3 = vcombine.low %v1214_v58, %v1278_v61 }
 0x351   : > { %v1341_v2 = vrot.slane %v1334_v60, %v2263_v20  ;;  %v1349_v9 = vrot.slane %v1342_v3, %v2263_v20 }
 0x352   : > { %v1246_v62 = vpop.trf.xlu0 }
 0x353   : > { %v1358_v7 = vcombine.low %v1333_v5, %v1341_v2  ;;  %v1359_v8 = vcombine.high %v1333_v5, %v1341_v2 }
 0x355   : > { %v1366_v13 = vrot.slane %v1358_v7, %v2275_v26  ;;  %v1373_v14 = vrot.slane %v1359_v8, %v2275_v26 }
 0x356   : > { %v1310_v4 = vpop.trf.xlu0 }
 0x357   : > { %v1350_v6 = vcombine.low %v1246_v62, %v1310_v4 }
 0x359   : > { %v1357_v10 = vrot.slane %v1350_v6, %v2263_v20 }
 0x35b   : > { %v1374_v11 = vcombine.low %v1349_v9, %v1357_v10  ;;  %v1375_v12 = vcombine.high %v1349_v9, %v1357_v10 }
 0x35d   : > { %v1382_v15 = vrot.slane %v1374_v11, %v2275_v26  ;;  %v1389_v16 = vrot.slane %v1375_v12, %v2275_v26 }
 0x35f   : > { %v1390_v19 = vcombine.low %v1366_v13, %v1382_v15  ;;  %v1391_v21 = vcombine.high %v1366_v13, %v1382_v15  ;;  %v1392_v22 = vcombine.low %v1373_v14, %v1389_v16  ;;  %v1393_v24 = vcombine.high %v1373_v14, %v1389_v16 }
 0x361   : > { %v1394_v20 = vpack.c.bf16 %v1390_v19, %v1390_v19  ;;  %v1395_v25 = vpack.c.bf16 %v1391_v21, %v1391_v21  ;;  %v1396_v27 = vpack.c.bf16 %v1392_v22, %v1392_v22  ;;  %v1397_v28 = vpack.c.bf16 %v1393_v24, %v1393_v24 }
 0x363   : > { %1398 = vst.msk [vmem:[%s286_s21] sm:$0xf] %vm673_vm2, %v1394_v20  ;;  %1399 = vst.msk [vmem:[%s286_s21 + $0x4] sm:$0xf] %vm673_vm2, %v1395_v25 }
 0x364   : > { %1400 = vst.msk [vmem:[%s286_s21 + $0x8] sm:$0xf] %vm673_vm2, %v1396_v27  ;;  %1401 = vst.msk [vmem:[%s286_s21 + $0xc] sm:$0xf] %vm673_vm2, %v1397_v28 }
 0x365   : > { %1938 = shalt.err (!%p1935_p7)
}
 0x366   : > { %s1939_s25 = scalar_lea.hbm %s2426_s15, 256  ;;  %s1943_s24 = scalar_lea.hbm %s2523_s4, 512 }
 0x367   : > { %p1940_p3 = scmp.ne.s32.totalorder %s2426_s15, %s1939_s25  ;;  %p1944_p6 = scmp.lt.u32.totalorder %s2426_s15, %s2523_s4 }
 0x368   : > { %p1945_p8 = scmp.lt.u32.totalorder %s1943_s24, %s1939_s25  ;;  %p1947_p11 = scmp.lt.u32.totalorder %s1939_s25, %s2426_s15 }
 0x369   : > { %p1941_p4 = pnand %p1940_p3, %p2186_p10 }
 0x36a   : > { %p1946_p12 = por %p1945_p8, %p1944_p6 }
 0x36b   : > { %p1942_p13 = pneg %p1941_p4 }
 0x36c   : > { %p1948_p0 = por %p1947_p11, %p1946_p12 }
 0x36e   : > { %p1949_p5 = pnand %p1948_p0, %p1942_p13 }
 0x370   : > { %1952 = shalt.err (!%p1949_p5)
}
 0x371   : > { %1749 = dma.vmem_to_hbm [thread:$0]  (%p2186_p10), %s2428_s16, 256, %s2426_s15, %s2442_s17, %s2055_s30, %s2055_s30, %s2059_s28  }
 0x372   : > { %s1953_s8 = scalar_lea.vmem %s2436_s26, 256  ;;  %s2061_s14 = smov [#allocation10]  }
 0x373   : > { %p1954_p9 = scmp.ne.s32.totalorder %s2436_s26, %s1953_s8  ;;  %s1957_s9 = sshll.u32 %s2061_s14, 4  ;;  %s1958_s9 = int_to_ptr.vmem [resolvable:$false] %s1957_s9 }
 0x374   : > { %s1959_s25 = scalar_lea.vmem %s1958_s9, 512  ;;  %p1960_p7 = scmp.lt.s32.totalorder %s2436_s26, %s1958_s9 }
 0x375   : > { %p1955_p1 = pnand %p1954_p9, %p2186_p10  ;;  %p1961_p3 = scmp.lt.s32.totalorder %s1959_s25, %s1953_s8 }
 0x377   : > { %p1956_p2 = pneg %p1955_p1  ;;  %p1962_p4 = por %p1961_p3, %p1960_p7 }
 0x379   : > { %p1963_p13 = pnand %p1962_p4, %p1956_p2 }
 0x37b   : > { %1966 = shalt.err (!%p1963_p13)
}
 0x37c   : > { %s1967_s16 = scalar_lea.hbm %s2434_s10, 256  ;;  %s1971_s12 = scalar_lea.hbm %s2524_s5, 512 }
 0x37d   : > { %p1968_p6 = scmp.ne.s32.totalorder %s2434_s10, %s1967_s16  ;;  %p1972_p11 = scmp.lt.u32.totalorder %s2434_s10, %s2524_s5 }
 0x37e   : > { %p1973_p0 = scmp.lt.u32.totalorder %s1971_s12, %s1967_s16  ;;  %p1975_p9 = scmp.lt.u32.totalorder %s1967_s16, %s2434_s10 }
 0x37f   : > { %p1969_p8 = pnand %p1968_p6, %p2186_p10 }
 0x380   : > { %p1974_p5 = por %p1973_p0, %p1972_p11 }
 0x381   : > { %p1970_p12 = pneg %p1969_p8 }
 0x382   : > { %p1976_p1 = por %p1975_p9, %p1974_p5 }
 0x384   : > { %p1977_p2 = pnand %p1976_p1, %p1970_p12 }
 0x386   : > { %1980 = shalt.err (!%p1977_p2)
}
 0x387   : > { %1750 = dma.vmem_to_hbm [thread:$0]  (%p2186_p10), %s2436_s26, 256, %s2434_s10, %s2442_s17, %s2055_s30, %s2055_s30, %s2059_s28  }
 0x388 PF: > { %s1552_s6 = sand.u32 1, %s2023_s18   ;;  %p2541_p7 = scmp.ne.s32.totalorder %s2530_s27, 0 }
 0x389   : > { %p2542_p3 = scmp.ge.s32.totalorder %s2043_s23, 2  ;;  %s1553_s8 = scalar_lea.sflag [#allocation4], %s1552_s6 }
 0x38b   : > { %p1763_p4 = pnand %p2542_p3, %p2541_p7 }
 0x38d   : > { %2014 = dma.done.wait (!%p1763_p4), %s1553_s8, 256  }
 0x38e   : > { %2016 = vsyncadd (!%p1763_p4), %s1553_s8, 4294967040  ;;  %s2543_s11 = sadd.s32 4294967294, %s2043_s23  }
 0x38f   : > { %s1561_s14 = sand.u32 1, %s2543_s11  }
 0x390   : > { %s1562_s9 = scalar_lea.sflag [#allocation9], %s1561_s14 }
 0x391   : > { %2018 = dma.done.wait (!%p1763_p4), %s1562_s9, 512  }
 0x392   : > { %2020 = vsyncadd (!%p1763_p4), %s1562_s9, 4294966784  ;;  %s26_s23 = sadd.s32 1, %s2043_s23   ;;  %s2544_s18 = smov %s2027_s19 }
 0x393   : > { %p23_p10 = scmp.ge.s32.totalorder %s26_s23, 4   ;;  %s2545_s19 = smov %s2031_s20 }
 0x394   : > { %s2546_s20 = smov %s2195_s13  ;;  %s2547_s21 = smov %s2039_s22 }
 0x395   : > { %s2548_s22 = smov %s2550_s7  ;;  %25 = sbr.rel (!%p23_p10) target bundleno = 9 (0x9), region = 113 }
 0x39c   :  { %1576 = vsyncpa [#allocation3], 1 }
 0x39d   :  { %1578 = vsyncpa [#allocation3 + $0x1], 1 }
 0x39e   :  { %1579 = vsyncpa [#allocation6], 1 }
 0x39f   :  { %1580 = vsyncpa [#allocation4], 1 }
 0x3a0   :  { %1582 = vsyncpa [#allocation4 + $0x1], 1 }
 0x3a1   :  { %1583 = vsyncpa [#allocation9], 1 }
 0x3a2   :  { %1585 = vsyncpa [#allocation9 + $0x1], 1 }

</bundles_post_ra>
